<compile_context>
chip_gen: v6e
topology: v6e:2x2x1
jax: 0.10.0
libtpu: 0.0.40
codegen_flags: <defaults>
</compile_context>

<pallas_src>
import math
from functools import partial

import jax
import jax.numpy as jnp
from jax import lax
from jax.experimental import pallas as pl
from jax.experimental.pallas import tpu as pltpu


# ------------------------------ tiling helper --------------------------------

def _pick_tile(dim, target, align):
    """Largest tile <= target that divides dim and is `align`-aligned.
    Falls back to the full dimension (block == array dim is always legal)."""
    if dim <= target:
        return dim
    t = (target // align) * align
    while t >= align:
        if dim % t == 0:
            return t
        t -= align
    return dim


# --------------------------- tiled linear kernel ------------------------------

def _linear_kernel(x_ref, w_ref, b_ref, o_ref, acc_ref):
    # grid = (M tiles, K tiles); K is the reduction axis (last, "arbitrary").
    @pl.when(pl.program_id(1) == 0)
    def _init():
        acc_ref[...] = jnp.zeros_like(acc_ref)

    acc_ref[...] += jnp.dot(x_ref[...], w_ref[...],
                            preferred_element_type=jnp.float32)

    @pl.when(pl.program_id(1) == pl.num_programs(1) - 1)
    def _finalize():
        o_ref[...] = (acc_ref[...] + b_ref[...]).astype(o_ref.dtype)


def pallas_linear(x2d, w_t, b, *, out_dtype=None, tm_target=256, tk_target=512):
    """y = x2d @ w_t + b.   x2d: (M, K), w_t: (K, N), b: (N,) -> (M, N)."""
    M, K = x2d.shape
    N = w_t.shape[1]
    out_dtype = out_dtype or x2d.dtype
    tm = _pick_tile(M, tm_target, 8)
    tk = _pick_tile(K, tk_target, 128)
    return pl.pallas_call(
        _linear_kernel,
        out_shape=jax.ShapeDtypeStruct((M, N), out_dtype),
        grid=(M // tm, K // tk),
        in_specs=[
            pl.BlockSpec((tm, tk), lambda i, k: (i, k)),
            pl.BlockSpec((tk, N), lambda i, k: (k, 0)),
            pl.BlockSpec((1, N), lambda i, k: (0, 0)),
        ],
        out_specs=pl.BlockSpec((tm, N), lambda i, k: (i, 0)),
        scratch_shapes=[pltpu.VMEM((tm, N), jnp.float32)],
        compiler_params=pltpu.CompilerParams(
            dimension_semantics=("parallel", "arbitrary"),
            vmem_limit_bytes=64 * 1024 * 1024),
    )(x2d, w_t, b.reshape(1, N))


# ----------------------------- attention kernel -------------------------------

def _attention_kernel(q_ref, k_ref, v_ref, *out_refs, num_heads, probs_mode):
    """One batch element per grid step; q/k/v refs are (T, 1, H, Dh) slices of
    the fused qkv tensor (q is already scaled by 1/sqrt(head_dim))."""
    H = num_heads
    o_ref = out_refs[0]
    w_ref = out_refs[1] if probs_mode != "none" else None

    q_all = q_ref[:, 0]            # (T, H, Dh)
    k_all = k_ref[:, 0]            # (S, H, Dh)
    v_all = v_ref[:, 0]            # (S, H, Dh)

    w_sum = None
    for h in range(H):             # static unroll over heads
        q = q_all[:, h, :]         # (T, Dh)
        k = k_all[:, h, :]         # (S, Dh)
        v = v_all[:, h, :]         # (S, Dh)
        # q @ k^T via a transposed contraction -- no k.T copy materialized.
        s = lax.dot_general(q, k, (((1,), (1,)), ((), ())),
                            preferred_element_type=jnp.float32)    # (T, S)
        m = jnp.max(s, axis=-1, keepdims=True)
        e = jnp.exp(s - m)
        p = e * pl.reciprocal(jnp.sum(e, axis=-1, keepdims=True), approx=True)
        o = lax.dot_general(p.astype(v.dtype), v, (((1,), (0,)), ((), ())),
                            preferred_element_type=jnp.float32)    # (T, Dh)
        o_ref[:, 0, h, :] = o.astype(o_ref.dtype)
        if probs_mode == "per_head":
            w_ref[0, h] = p
        elif probs_mode == "mean":
            w_sum = p if w_sum is None else w_sum + p

    if probs_mode == "mean":
        w_ref[0] = w_sum * (1.0 / H)


def pallas_attention(qkv, *, num_heads, head_dim, probs_mode="mean",
                     probs_dtype=jnp.float32):
    """qkv: (T, 3*B, H, Dh) fused projection output (dim1 ordered b-major,
    then q/k/v). Returns (attn (T, B, H, Dh), probs or None)."""
    T, B3, H, Dh = qkv.shape
    B = B3 // 3
    S = T
    blk = (T, 1, H, Dh)
    q_spec = pl.BlockSpec(blk, lambda b: (0, 3 * b + 0, 0, 0))
    k_spec = pl.BlockSpec(blk, lambda b: (0, 3 * b + 1, 0, 0))
    v_spec = pl.BlockSpec(blk, lambda b: (0, 3 * b + 2, 0, 0))

    out_shapes = [jax.ShapeDtypeStruct((T, B, H, Dh), qkv.dtype)]
    out_specs = [pl.BlockSpec((T, 1, H, Dh), lambda b: (0, b, 0, 0))]
    if probs_mode == "per_head":
        out_shapes.append(jax.ShapeDtypeStruct((B, H, T, S), probs_dtype))
        out_specs.append(pl.BlockSpec((1, H, T, S), lambda b: (b, 0, 0, 0)))
    elif probs_mode == "mean":
        out_shapes.append(jax.ShapeDtypeStruct((B, T, S), probs_dtype))
        out_specs.append(pl.BlockSpec((1, T, S), lambda b: (b, 0, 0)))

    kernel = partial(_attention_kernel, num_heads=num_heads,
                     probs_mode=probs_mode)
    outs = pl.pallas_call(
        kernel,
        out_shape=tuple(out_shapes),
        grid=(B,),
        in_specs=[q_spec, k_spec, v_spec],
        out_specs=tuple(out_specs),
        compiler_params=pltpu.CompilerParams(
            dimension_semantics=("parallel",),
            vmem_limit_bytes=64 * 1024 * 1024),
    )(qkv, qkv, qkv)

    if probs_mode == "none":
        return outs[0], None
    return outs[0], outs[1]


# --------------------------- module-level wrapper -----------------------------

def multihead_attention_forward(query, params, num_heads,
                                need_weights=True, need_head_weights=False):
    """Self-attention forward pass matching fairseq MultiheadAttention.

    query: (T, B, E) float32
    returns: (attn (T, B, E), attn_weights) where attn_weights is
             (B, T, S) averaged over heads, (H, B, T, S) if need_head_weights,
             or None if need_weights=False.
    """
    T, B, E = query.shape
    H = num_heads
    Dh = E // H
    scaling = Dh ** -0.5
    if need_head_weights:
        need_weights = True

    # Fused QKV projection with scaling folded into the q weights/bias.
    w_qkv_t = jnp.concatenate([params["q_w"].T * scaling,
                               params["k_w"].T,
                               params["v_w"].T], axis=1)            # (E, 3E)
    b_qkv = jnp.concatenate([params["q_b"] * scaling,
                             params["k_b"],
                             params["v_b"]])                        # (3E,)

    x2d = query.reshape(T * B, E)
    qkv = pallas_linear(x2d, w_qkv_t, b_qkv)                        # (T*B, 3E)
    # Free reshape: row (t, b), col (c, h, d) -> (T, 3B, H, Dh), dim1 = 3*b+c.
    qkv = qkv.reshape(T, 3 * B, H, Dh)

    probs_mode = "none" if not need_weights else (
        "per_head" if need_head_weights else "mean")
    attn, probs = pallas_attention(qkv, num_heads=H, head_dim=Dh,
                                   probs_mode=probs_mode)           # (T,B,H,Dh)

    attn2d = attn.reshape(T * B, E)                                 # free reshape
    out = pallas_linear(attn2d, params["out_w"].T,
                        params["out_b"]).reshape(T, B, E)

    attn_weights = None
    if need_weights:
        if need_head_weights:
            attn_weights = probs.transpose(1, 0, 2, 3)              # (H, B, T, S)
        else:
            attn_weights = probs                                    # (B, T, S)
    return out, attn_weights


# -------------------------------- param init ----------------------------------

def xavier_uniform(key, shape, gain=1.0):
    fan_out, fan_in = shape
    limit = gain * math.sqrt(6.0 / (fan_in + fan_out))
    return jax.random.uniform(key, shape, jnp.float32, -limit, limit)


def init_params(key, embed_dim):
    ks = jax.random.split(key, 8)
    g = 1.0 / math.sqrt(2.0)   # qkv_same_dim init from reset_parameters()
    return {
        "q_w": xavier_uniform(ks[0], (embed_dim, embed_dim), g),
        "k_w": xavier_uniform(ks[1], (embed_dim, embed_dim), g),
        "v_w": xavier_uniform(ks[2], (embed_dim, embed_dim), g),
        "out_w": xavier_uniform(ks[3], (embed_dim, embed_dim), 1.0),
        "q_b": jax.random.normal(ks[4], (embed_dim,), jnp.float32) * 0.02,
        "k_b": jax.random.normal(ks[5], (embed_dim,), jnp.float32) * 0.02,
        "v_b": jax.random.normal(ks[6], (embed_dim,), jnp.float32) * 0.02,
        "out_b": jnp.zeros((embed_dim,), jnp.float32),
    }


# --------------------------------- reference -----------------------------------

def reference_forward(query, params, num_heads):
    T, B, E = query.shape
    hd = E // num_heads
    x = query.reshape(T * B, E)
    q = (x @ params["q_w"].T + params["q_b"]) * (hd ** -0.5)
    k = x @ params["k_w"].T + params["k_b"]
    v = x @ params["v_w"].T + params["v_b"]
    to_h = lambda t: t.reshape(T, B * num_heads, hd).transpose(1, 0, 2)
    qh, kh, vh = to_h(q), to_h(k), to_h(v)
    s = jnp.einsum("btd,bsd->bts", qh, kh)
    p = jax.nn.softmax(s, axis=-1)
    a = jnp.einsum("bts,bsd->btd", p, vh)
    a = a.transpose(1, 0, 2).reshape(T * B, E)
    a = (a @ params["out_w"].T + params["out_b"]).reshape(T, B, E)
    w = jnp.mean(p.reshape(B, num_heads, T, T).transpose(1, 0, 2, 3), axis=0)
    return a, w


# ----------------------------------- main ---------------------------------------

if __name__ == "__main__":
    T, B, E, H = 8, 2, 32, 4
    key = jax.random.PRNGKey(0)
    k_q, k_p = jax.random.split(key)
    query = jax.random.normal(k_q, (T, B, E), jnp.float32)
    params = init_params(k_p, E)

    attn, attn_weights = multihead_attention_forward(query, params, H)
    attn = jax.block_until_ready(attn)
    attn_weights = jax.block_until_ready(attn_weights)

    ref_attn, ref_w = reference_forward(query, params, H)
    assert attn.shape == (T, B, E)
    assert attn_weights.shape == (B, T, T)
    # Tolerance accounts for pl.reciprocal(approx=True) in the softmax denominator.
    assert jnp.allclose(attn, ref_attn, atol=5e-3, rtol=5e-3)
    assert jnp.allclose(attn_weights, ref_w, atol=5e-3, rtol=5e-3)

    # need_weights=False path: no attention-probability writeback at all.
    attn_nw, w_none = multihead_attention_forward(query, params, H,
                                                  need_weights=False)
    attn_nw = jax.block_until_ready(attn_nw)
    assert w_none is None
    assert jnp.allclose(attn_nw, ref_attn, atol=5e-3, rtol=5e-3)

    print("KERNEL_OK")
</pallas_src>

<mosaic_0001>
module attributes {stable_mosaic.version = 11 : i64} {
  func.func @_linear_kernel(%arg0: i32, %arg1: i32, %arg2: memref<16x32xf32, #tpu.memory_space<vmem>>, %arg3: memref<32x96xf32, #tpu.memory_space<vmem>>, %arg4: memref<1x96xf32, #tpu.memory_space<vmem>>, %arg5: memref<16x96xf32, #tpu.memory_space<vmem>>, %arg6: memref<16x96xf32, #tpu.memory_space<vmem>>) attributes {dimension_semantics = [#tpu.dimension_semantics<parallel>, #tpu.dimension_semantics<arbitrary>], iteration_bounds = array<i64: 1, 1>, scalar_prefetch = 0 : i64, scratch_operands = 1 : i64, tpu.core_type = #tpu.core_type<tc>, window_params = [{transform_indices = @transform_0, window_bounds = array<i64: 16, 32>}, {transform_indices = @transform_1, window_bounds = array<i64: 32, 96>}, {pipeline_mode = #tpu.pipeline_mode<synchronous>, transform_indices = @transform_2, window_bounds = array<i64: 1, 96>}, {transform_indices = @transform_3, window_bounds = array<i64: 16, 96>}]} {
    %c0_i32 = arith.constant 0 : i32
    %0 = arith.cmpi eq, %arg1, %c0_i32 : i32
    %1 = arith.extui %0 : i1 to i32
    %c0_i32_0 = arith.constant 0 : i32
    %2 = arith.cmpi ne, %1, %c0_i32_0 : i32
    scf.if %2 {
      %cst_10 = arith.constant 0.000000e+00 : f32
      %12 = vector.broadcast %cst_10 : f32 to vector<16x96xf32>
      %c0_11 = arith.constant 0 : index
      %c0_12 = arith.constant 0 : index
      %13 = vector.load %arg6[%c0_11, %c0_12] : memref<16x96xf32, #tpu.memory_space<vmem>>, vector<16x96xf32>
      tpu.vector_store %arg6[%c0_11, %c0_12], %12 {strides = array<i32>} : memref<16x96xf32, #tpu.memory_space<vmem>>, vector<16x96xf32>,
    } else {
    }
    %c0 = arith.constant 0 : index
    %c0_1 = arith.constant 0 : index
    %3 = vector.load %arg6[%c0, %c0_1] : memref<16x96xf32, #tpu.memory_space<vmem>>, vector<16x96xf32>
    %c0_2 = arith.constant 0 : index
    %c0_3 = arith.constant 0 : index
    %4 = vector.load %arg2[%c0_2, %c0_3] : memref<16x32xf32, #tpu.memory_space<vmem>>, vector<16x32xf32>
    %c0_4 = arith.constant 0 : index
    %c0_5 = arith.constant 0 : index
    %5 = vector.load %arg3[%c0_4, %c0_5] : memref<32x96xf32, #tpu.memory_space<vmem>>, vector<32x96xf32>
    %cst = arith.constant dense<0.000000e+00> : vector<16x96xf32>
    %6 = tpu.matmul %4, %5, %cst {dimension_numbers = #tpu.dot_dimension_numbers<[1], [0], [0], [1], [0, 0, 1, 1], [], []>} : vector<16x32xf32>, vector<32x96xf32>, vector<16x96xf32> -> vector<16x96xf32>
    %7 = arith.addf %3, %6 : vector<16x96xf32>
    %c0_6 = arith.constant 0 : index
    %c0_7 = arith.constant 0 : index
    %8 = vector.load %arg6[%c0_6, %c0_7] : memref<16x96xf32, #tpu.memory_space<vmem>>, vector<16x96xf32>
    tpu.vector_store %arg6[%c0_6, %c0_7], %7 {strides = array<i32>} : memref<16x96xf32, #tpu.memory_space<vmem>>, vector<16x96xf32>,
    %c0_i32_8 = arith.constant 0 : i32
    %9 = arith.cmpi eq, %arg1, %c0_i32_8 : i32
    %10 = arith.extui %9 : i1 to i32
    %c0_i32_9 = arith.constant 0 : i32
    %11 = arith.cmpi ne, %10, %c0_i32_9 : i32
    scf.if %11 {
      %c0_10 = arith.constant 0 : index
      %c0_11 = arith.constant 0 : index
      %12 = vector.load %arg6[%c0_10, %c0_11] : memref<16x96xf32, #tpu.memory_space<vmem>>, vector<16x96xf32>
      %c0_12 = arith.constant 0 : index
      %c0_13 = arith.constant 0 : index
      %13 = vector.load %arg4[%c0_12, %c0_13] : memref<1x96xf32, #tpu.memory_space<vmem>>, vector<1x96xf32>
      %14 = vector.broadcast %13 : vector<1x96xf32> to vector<16x96xf32>
      %15 = arith.addf %12, %14 : vector<16x96xf32>
      %c0_14 = arith.constant 0 : index
      %c0_15 = arith.constant 0 : index
      %16 = vector.load %arg5[%c0_14, %c0_15] : memref<16x96xf32, #tpu.memory_space<vmem>>, vector<16x96xf32>
      tpu.vector_store %arg5[%c0_14, %c0_15], %15 {strides = array<i32>} : memref<16x96xf32, #tpu.memory_space<vmem>>, vector<16x96xf32>,
    } else {
    }
    return
  }
  func.func @transform_0(%arg0: i32, %arg1: i32) -> (i32, i32) {
    %c0_i32 = arith.constant 0 : i32
    return %arg0, %arg1 : i32, i32
  }
  func.func @transform_1(%arg0: i32, %arg1: i32) -> (i32, i32) {
    %c0_i32 = arith.constant 0 : i32
    %c0_i32_0 = arith.constant 0 : i32
    return %arg1, %c0_i32 : i32, i32
  }
  func.func @transform_2(%arg0: i32, %arg1: i32) -> (i32, i32) {
    %c0_i32 = arith.constant 0 : i32
    %c0_i32_0 = arith.constant 0 : i32
    %c0_i32_1 = arith.constant 0 : i32
    return %c0_i32, %c0_i32_0 : i32, i32
  }
  func.func @transform_3(%arg0: i32, %arg1: i32) -> (i32, i32) {
    %c0_i32 = arith.constant 0 : i32
    %c0_i32_0 = arith.constant 0 : i32
    return %arg0, %c0_i32 : i32, i32
  }
}

</mosaic_0001>

<bundles_post_ra>
// kernel: tpu_custom_call.1
= control target key start
LH: loop header
LB: loop body
LE: loop exit
PB: predicated region body
PF: predicated region fallthrough
CT: control target
= control target key end

     0   :  { %8 = vsyncpa [#allocation4], 0  ;;  %s326_s0 = inlined_call_operand.hbm [shape: f32[16,32], index: 0, kind: input, shape index: {}]   ;;  %s327_s1 = inlined_call_operand.hbm [shape: f32[32,96], index: 1, kind: input, shape index: {}]   ;;  %s328_s2 = inlined_call_operand.vmem [shape: f32[1,96], index: 2, kind: input, shape index: {}]   ;;  %s329_s3 = inlined_call_operand.hbm [shape: f32[16,96], index: 3, kind: output, shape index: {}]  }
   0x1   :  { %9 = vsyncpa [#allocation7], 0 }
   0x2   :  { %10 = vsyncpa [#allocation5], 0  ;;  %s271_s12 = smov [#allocation3]  }
   0x3   :  { %s16_s13 = sshll.u32 %s271_s12, 4  ;;  %s17_s13 = int_to_ptr.vmem [resolvable:$true] %s16_s13 }
   0x4   :  { %s213_s14 = scalar_lea.vmem %s17_s13, 256  ;;  %p218_p1 = scmp.lt.s32.totalorder %s17_s13, %s17_s13 }
   0x5   :  { %p214_p0 = scmp.ne.s32.totalorder %s17_s13, %s213_s14  ;;  %p219_p2 = scmp.lt.s32.totalorder %s213_s14, %s213_s14 }
   0x7   :  { %p220_p3 = por %p219_p2, %p218_p1 }
   0x9   :  { %p221_p4 = pnand %p220_p3, %p214_p0 }
   0xb   :  { %224 = shalt.err (!%p221_p4)
}
   0xc   :  { %s272_s15 = smov 128   ;;  %s273_s16 = smov 8  }
   0xd   :  { %22 = dma.hbm_to_vmem [thread:$0]  %s326_s0, 256, %s17_s13, [#allocation4], %s272_s15, %s272_s15, %s273_s16  }
   0xe   :  { %s274_s19 = smov [#allocation6]  }
   0xf   :  { %s28_s20 = sshll.u32 %s274_s19, 4  ;;  %s29_s20 = int_to_ptr.vmem [resolvable:$true] %s28_s20 }
  0x10   :  { %s233_s21 = scalar_lea.vmem %s29_s20, 512  ;;  %p238_p6 = scmp.lt.s32.totalorder %s29_s20, %s29_s20 }
  0x11   :  { %p234_p5 = scmp.ne.s32.totalorder %s29_s20, %s233_s21  ;;  %p239_p7 = scmp.lt.s32.totalorder %s233_s21, %s233_s21 }
  0x13   :  { %p240_p8 = por %p239_p7, %p238_p6 }
  0x15   :  { %p241_p9 = pnand %p240_p8, %p234_p5 }
  0x17   :  { %244 = shalt.err (!%p241_p9)
}
  0x18   :  { %34 = dma.hbm_to_vmem [thread:$0]  %s327_s1, 512, %s29_s20, [#allocation7], %s272_s15, %s272_s15, %s273_s16  }
  0x19   :  { %265 = dma.done.wait [#allocation4], 256  }
  0x1a   :  { %266 = vsyncadd [#allocation4], 4294967040 }
  0x1b   :  { %267 = dma.done.wait [#allocation7], 512  }
  0x1c   :  { %268 = vsyncadd [#allocation7], 4294966784  ;;  %vm47_vm0 = vcmask 785408   ;;  %v275_v0 = vmov 0.0   ;;  %vm58_vm1 = vcmask 261120   ;;  %v57_v1 = vld [vmem:[#allocation6 + $0x18] sm:$0xff] }
  0x1d   :  { %49 = vst.msk [vmem:[#allocation2 + $0x8] sm:$0xff] %vm47_vm0, %v275_v0  ;;  %48 = vst.msk [vmem:[#allocation2] sm:$0xff] %vm47_vm0, %v275_v0  ;;  %v56_v2 = vld [vmem:[#allocation6 + $0x10] sm:$0xff]  ;;  %188 = vmatprep.subr.mxu0 %v57_v1  ;;  %v55_v4 = vld [vmem:[#allocation6 + $0x8] sm:$0xff]  ;;  %s276_s24 = smov [#allocation8]  }
  0x1e   :  { %v52_v3 = vld [vmem:[#allocation3] sm:$0xff]  ;;  %189 = vmatpush3.msra.mxu0 %v57_v1  ;;  %v54_v5 = vld [vmem:[#allocation6] sm:$0xff]  ;;  %v53_v6 = vld [vmem:[#allocation3 + $0x8] sm:$0xff]  ;;  %s166_s25 = sshll.u32 %s276_s24, 4  ;;  %s167_s25 = int_to_ptr.vmem [resolvable:$true] %s166_s25 }
  0x1f   :  { %196 = vmatprep.mubr.msk.f32.mxu0 %vm58_vm1, %v52_v3  ;;  %190 = vmatprep.subr.mxu0 %v56_v2  ;;  %v181_v13 = vld [vmem:[%s328_s2] ss:$0 sm:$0xff]  ;;  %s245_s26 = scalar_lea.vmem %s167_s25, 256  ;;  %p250_p11 = scmp.lt.s32.totalorder %s167_s25, %s167_s25 }
  0x20   :  { %191 = vmatpush3.msra.mxu0 %v56_v2  ;;  %p246_p10 = scmp.ne.s32.totalorder %s167_s25, %s245_s26  ;;  %p251_p12 = scmp.lt.s32.totalorder %s245_s26, %s245_s26 }
  0x21   :  { %192 = vmatprep.subr.mxu0 %v55_v4 }
  0x22   :  { %193 = vmatpush3.msra.mxu0 %v55_v4  ;;  %p252_p13 = por %p251_p12, %p250_p11 }
  0x23   :  { %194 = vmatprep.subr.mxu0 %v54_v5 }
  0x24   :  { %195 = vmatpush3.msra.mxu0 %v54_v5  ;;  %v51_v7 = vld [vmem:[#allocation2 + $0x8] sm:$0xff]  ;;  %v50_v9 = vld [vmem:[#allocation2] sm:$0xff]  ;;  %p253_p0 = pnand %p252_p13, %p246_p10 }
  0x25   :  { %197 = vmatmul.mubr.msk.f32.vlgmr.msra.gmra.mxu0 %vm58_vm1, %v53_v6 }
  0xe5   :  { %v198_v8 = vpop.f32.mrf.mxu0 }
  0xe6   :  { %v141_v10 = vadd.f32 %v198_v8, %v51_v7 }
  0xe7   :  { %v131_v11 = vpop.f32.mrf.mxu0 }
  0xe8   :  { %144 = vst.msk [vmem:[#allocation2 + $0x8] sm:$0xff] %vm47_vm0, %v141_v10  ;;  %v140_v12 = vadd.f32 %v131_v11, %v50_v9 }
  0xea   :  { %143 = vst.msk [vmem:[#allocation2] sm:$0xff] %vm47_vm0, %v140_v12 }
  0xef   :  { %v149_v14 = vld [vmem:[#allocation2 + $0x8] sm:$0xff] }
  0xf0   :  { %v158_v15 = vadd.f32 %v181_v13, %v149_v14 }
  0xf1   :  { %v148_v16 = vld [vmem:[#allocation2] sm:$0xff] }
  0xf2   :  { %v157_v17 = vadd.f32 %v181_v13, %v148_v16  ;;  %160 = vst.msk [vmem:[#allocation8 + $0x8] sm:$0xff] %vm47_vm0, %v158_v15 }
  0xf4   :  { %159 = vst.msk [vmem:[#allocation8] sm:$0xff] %vm47_vm0, %v157_v17 }
  0xf5   :  { %256 = shalt.err (!%p253_p0)
}
  0xf6   :  { %172 = dma.vmem_to_hbm [thread:$0]  %s167_s25, 256, %s329_s3, [#allocation5], %s272_s15, %s272_s15, %s273_s16  }
  0xf7   :  { %269 = dma.done.wait [#allocation5], 256  }
  0xf8   :  { %270 = vsyncadd [#allocation5], 4294967040 }
  0xf9   :  { %176 = vsyncpa [#allocation4], 1 }
  0xfa   :  { %177 = vsyncpa [#allocation7], 1 }
  0xfb   :  { %178 = vsyncpa [#allocation5], 1 }

</bundles_post_ra>
